<compile_context>
chip_gen: v7x
topology: tpu7x:2x2x1
jax: 0.10.0
libtpu: 0.0.40
codegen_flags: <defaults>
</compile_context>

<pallas_src>
import functools

import jax
import jax.numpy as jnp
from jax import lax
from jax.experimental import pallas as pl
from jax.experimental.pallas import tpu as pltpu

LANES = 128
MAX_TILE_ROWS = 2048  # (2048, 128) f32 block = 1 MiB per input buffer


def _round_up(x, m):
    return ((x + m - 1) // m) * m


def _sublane_align(dtype):
    itemsize = jnp.dtype(dtype).itemsize
    return {4: 8, 2: 16, 1: 32}.get(itemsize, 8)


def _dice_reduce_kernel(nrows_ref, pred_ref, true_ref,
                        inter_ref, psum_ref, tsum_ref,
                        acc_i, acc_p, acc_t, *, tile_rows):
    i = pl.program_id(0)

    @pl.when(i == 0)
    def _init():
        acc_i[...] = jnp.zeros_like(acc_i)
        acc_p[...] = jnp.zeros_like(acc_p)
        acc_t[...] = jnp.zeros_like(acc_t)

    p = pred_ref[...].astype(jnp.float32)
    t = true_ref[...].astype(jnp.float32)

    # Row-validity mask: the last grid block may extend past the array rows
    # (the wrapper does NOT pad the inputs up to the tile size, and the
    # out-of-bounds part of the VMEM buffer is stale/garbage).
    row_ids = i * tile_rows + lax.broadcasted_iota(
        jnp.int32, (tile_rows, 1), 0)
    valid = row_ids < nrows_ref[0]                      # (tile_rows, 1) bool

    # clamp(1e-7, 1-1e-7) cannot change the outcome of a >0.5 threshold,
    # so it is dropped.  Select instead of cast+multiply for intersection.
    pb = (p > 0.5) & valid                              # (tile_rows, LANES)
    inter_part = jnp.where(pb, t, 0.0)
    pcnt_part = pb.astype(jnp.float32)
    tsum_part = jnp.where(valid, t, 0.0)

    # Row-axis partial sums into VMEM vector accumulators (VPU adds);
    # the expensive cross-lane reduce is deferred to the last step.
    acc_i[...] += jnp.sum(inter_part, axis=0, keepdims=True)
    acc_p[...] += jnp.sum(pcnt_part, axis=0, keepdims=True)
    acc_t[...] += jnp.sum(tsum_part, axis=0, keepdims=True)

    @pl.when(i == pl.num_programs(0) - 1)
    def _finalize():
        inter_ref[0, 0] = jnp.sum(acc_i[...])
        psum_ref[0, 0] = jnp.sum(acc_p[...])
        tsum_ref[0, 0] = jnp.sum(acc_t[...])


@functools.partial(jax.jit, static_argnames=("smooth",))
def dice_sigmoid_eval(pred, true, smooth=1.0):
    """Pallas equivalent of the PyTorch `sigmoid` Dice module forward."""
    assert pred.shape == true.shape

    total = pred.size
    p_flat = pred.reshape(-1)
    t_flat = true.reshape(-1)

    # Only pad when the element count is not lane-aligned (zero pads are
    # inert: 0 > 0.5 is False and the true pad contributes 0 to the sums).
    pad = (-total) % LANES
    if pad:
        p_flat = jnp.pad(p_flat, (0, pad))
        t_flat = jnp.pad(t_flat, (0, pad))

    rows = p_flat.size // LANES
    p2d = p_flat.reshape(rows, LANES)
    t2d = t_flat.reshape(rows, LANES)

    # Tile rows: as large as possible (<= MAX_TILE_ROWS), sublane-aligned for
    # the narrower of the two dtypes, never larger than the array itself so
    # only the final grid block can be partially out-of-bounds.
    align = max(_sublane_align(p2d.dtype), _sublane_align(t2d.dtype))
    rows_aligned_down = (rows // align) * align
    if rows_aligned_down == 0:
        # Tiny input: pad up to one aligned tile (negligible cost here).
        extra = _round_up(rows, align) - rows
        p2d = jnp.pad(p2d, ((0, extra), (0, 0)))
        t2d = jnp.pad(t2d, ((0, extra), (0, 0)))
        rows = rows + extra
        rows_aligned_down = rows
    tile_rows = min(MAX_TILE_ROWS, rows_aligned_down)
    grid = (pl.cdiv(rows, tile_rows),)

    nrows = jnp.array([rows], dtype=jnp.int32)

    scalar_out_spec = pl.BlockSpec(
        (1, 1), lambda i, n: (0, 0), memory_space=pltpu.SMEM)

    kernel = functools.partial(_dice_reduce_kernel, tile_rows=tile_rows)

    inter, psum, tsum = pl.pallas_call(
        kernel,
        out_shape=(
            jax.ShapeDtypeStruct((1, 1), jnp.float32),
            jax.ShapeDtypeStruct((1, 1), jnp.float32),
            jax.ShapeDtypeStruct((1, 1), jnp.float32),
        ),
        grid_spec=pltpu.PrefetchScalarGridSpec(
            num_scalar_prefetch=1,
            grid=grid,
            in_specs=[
                pl.BlockSpec((tile_rows, LANES), lambda i, n: (i, 0)),
                pl.BlockSpec((tile_rows, LANES), lambda i, n: (i, 0)),
            ],
            out_specs=(scalar_out_spec, scalar_out_spec, scalar_out_spec),
            scratch_shapes=[
                pltpu.VMEM((1, LANES), jnp.float32),
                pltpu.VMEM((1, LANES), jnp.float32),
                pltpu.VMEM((1, LANES), jnp.float32),
            ],
        ),
        compiler_params=pltpu.CompilerParams(
            dimension_semantics=("arbitrary",),
            vmem_limit_bytes=64 << 20,
        ),
    )(nrows, p2d, t2d)

    # TODO(synk): on v7x the reduction could additionally be sharded across
    # the two TensorCores with a leading "parallel" grid axis and per-core
    # partial outputs; kept single-core for portability.
    dice = (2.0 * inter[0, 0] + smooth) / (psum[0, 0] + tsum[0, 0] + smooth)
    # torch.mean over a scalar is the identity.
    return dice


def _reference(pred, true, smooth=1.0):
    bs = pred.shape[0]
    p = jnp.clip(pred.astype(jnp.float32), 1e-07, 1.0 - 1e-07).reshape(bs, -1)
    pb = (p > 0.5).astype(jnp.float32)
    t = true.reshape(bs, -1).astype(jnp.float32)
    inter = jnp.sum(pb * t)
    return (2.0 * inter + smooth) / (jnp.sum(pb) + jnp.sum(t) + smooth)


if __name__ == "__main__":
    key = jax.random.PRNGKey(0)

    test_cases = [
        ((2, 4, 16, 16), jnp.float32),    # lane-aligned, single tile
        ((1, 1, 52, 50), jnp.float32),    # not lane-aligned -> tiny pad + mask
        ((2, 8, 128, 128), jnp.float32),  # multiple grid steps / accumulation
        ((2, 8, 64, 64), jnp.bfloat16),   # narrow dtype streams at native width
    ]

    for shape, dtype in test_cases:
        key, k1, k2 = jax.random.split(key, 3)
        pred = jax.random.uniform(k1, shape, dtype=jnp.float32).astype(dtype)
        true = (jax.random.uniform(k2, shape) > 0.5).astype(dtype)

        out = dice_sigmoid_eval(pred, true, smooth=1.0)
        out = jax.block_until_ready(out)

        ref = _reference(pred, true, smooth=1.0)
        assert jnp.allclose(out, ref, rtol=1e-3, atol=1e-6), (shape, out, ref)

    print("KERNEL_OK")
</pallas_src>

<mosaic_0001>
module attributes {stable_mosaic.version = 11 : i64} {
  func.func @_dice_reduce_kernel(%arg0: i32, %arg1: memref<1xi32, #tpu.memory_space<smem>>, %arg2: memref<16x128xf32, #tpu.memory_space<vmem>>, %arg3: memref<16x128xf32, #tpu.memory_space<vmem>>, %arg4: memref<1x1xf32, #tpu.memory_space<smem>>, %arg5: memref<1x1xf32, #tpu.memory_space<smem>>, %arg6: memref<1x1xf32, #tpu.memory_space<smem>>, %arg7: memref<1x128xf32, #tpu.memory_space<vmem>>, %arg8: memref<1x128xf32, #tpu.memory_space<vmem>>, %arg9: memref<1x128xf32, #tpu.memory_space<vmem>>) attributes {dimension_semantics = [#tpu.dimension_semantics<arbitrary>], iteration_bounds = array<i64: 1>, scalar_prefetch = 1 : i64, scratch_operands = 3 : i64, tpu.core_type = #tpu.core_type<tc>, window_params = [{transform_indices = @transform_0, window_bounds = array<i64: 16, 128>}, {transform_indices = @transform_1, window_bounds = array<i64: 16, 128>}, {transform_indices = @transform_2, window_bounds = array<i64: 1, 1>}, {transform_indices = @transform_3, window_bounds = array<i64: 1, 1>}, {transform_indices = @transform_4, window_bounds = array<i64: 1, 1>}]} {
    %c0_i32 = arith.constant 0 : i32
    %0 = arith.cmpi eq, %arg0, %c0_i32 : i32
    %1 = arith.extui %0 : i1 to i32
    %c0_i32_0 = arith.constant 0 : i32
    %2 = arith.cmpi ne, %1, %c0_i32_0 : i32
    scf.if %2 {
      %cst_24 = arith.constant 0.000000e+00 : f32
      %42 = vector.broadcast %cst_24 : f32 to vector<1x128xf32>
      %c0_25 = arith.constant 0 : index
      %c0_26 = arith.constant 0 : index
      %43 = vector.load %arg7[%c0_25, %c0_26] : memref<1x128xf32, #tpu.memory_space<vmem>>, vector<1x128xf32>
      tpu.vector_store %arg7[%c0_25, %c0_26], %42 {strides = array<i32>} : memref<1x128xf32, #tpu.memory_space<vmem>>, vector<1x128xf32>,
      %cst_27 = arith.constant 0.000000e+00 : f32
      %44 = vector.broadcast %cst_27 : f32 to vector<1x128xf32>
      %c0_28 = arith.constant 0 : index
      %c0_29 = arith.constant 0 : index
      %45 = vector.load %arg8[%c0_28, %c0_29] : memref<1x128xf32, #tpu.memory_space<vmem>>, vector<1x128xf32>
      tpu.vector_store %arg8[%c0_28, %c0_29], %44 {strides = array<i32>} : memref<1x128xf32, #tpu.memory_space<vmem>>, vector<1x128xf32>,
      %cst_30 = arith.constant 0.000000e+00 : f32
      %46 = vector.broadcast %cst_30 : f32 to vector<1x128xf32>
      %c0_31 = arith.constant 0 : index
      %c0_32 = arith.constant 0 : index
      %47 = vector.load %arg9[%c0_31, %c0_32] : memref<1x128xf32, #tpu.memory_space<vmem>>, vector<1x128xf32>
      tpu.vector_store %arg9[%c0_31, %c0_32], %46 {strides = array<i32>} : memref<1x128xf32, #tpu.memory_space<vmem>>, vector<1x128xf32>,
    } else {
    }
    %c0 = arith.constant 0 : index
    %c0_1 = arith.constant 0 : index
    %3 = vector.load %arg2[%c0, %c0_1] : memref<16x128xf32, #tpu.memory_space<vmem>>, vector<16x128xf32>
    %c0_2 = arith.constant 0 : index
    %c0_3 = arith.constant 0 : index
    %4 = vector.load %arg3[%c0_2, %c0_3] : memref<16x128xf32, #tpu.memory_space<vmem>>, vector<16x128xf32>
    %c16_i32 = arith.constant 16 : i32
    %5 = arith.muli %arg0, %c16_i32 : i32
    %6 = tpu.iota {dimensions = array<i32: 0>} : vector<16x1xi32>
    %7 = vector.broadcast %5 : i32 to vector<16x1xi32>
    %8 = arith.addi %7, %6 : vector<16x1xi32>
    %c0_4 = arith.constant 0 : index
    %9 = memref.load %arg1[%c0_4] : memref<1xi32, #tpu.memory_space<smem>>
    %10 = vector.broadcast %9 : i32 to vector<16x1xi32>
    %11 = arith.cmpi slt, %8, %10 : vector<16x1xi32>
    %cst = arith.constant 5.000000e-01 : f32
    %12 = vector.broadcast %cst : f32 to vector<16x128xf32>
    %13 = arith.cmpf ogt, %3, %12 : vector<16x128xf32>
    %14 = vector.broadcast %11 : vector<16x1xi1> to vector<16x128xi1>
    %15 = arith.andi %13, %14 : vector<16x128xi1>
    %cst_5 = arith.constant 0.000000e+00 : f32
    %16 = vector.broadcast %cst_5 : f32 to vector<16x128xf32>
    %17 = arith.select %15, %4, %16 : vector<16x128xi1>, vector<16x128xf32>
    %18 = arith.extui %15 : vector<16x128xi1> to vector<16x128xi32>
    %19 = arith.sitofp %18 : vector<16x128xi32> to vector<16x128xf32>
    %cst_6 = arith.constant 0.000000e+00 : f32
    %20 = vector.shape_cast %11 : vector<16x1xi1> to vector<16x1xi1>
    %21 = vector.broadcast %20 : vector<16x1xi1> to vector<16x128xi1>
    %22 = vector.broadcast %cst_6 : f32 to vector<16x128xf32>
    %23 = arith.select %21, %4, %22 : vector<16x128xi1>, vector<16x128xf32>
    %c0_7 = arith.constant 0 : index
    %c0_8 = arith.constant 0 : index
    %24 = vector.load %arg7[%c0_7, %c0_8] : memref<1x128xf32, #tpu.memory_space<vmem>>, vector<1x128xf32>
    %cst_9 = arith.constant dense<0.000000e+00> : vector<128xf32>
    %25 = vector.multi_reduction <add>, %17, %cst_9 [0] : vector<16x128xf32> to vector<128xf32>
    %26 = vector.shape_cast %25 : vector<128xf32> to vector<1x128xf32>
    %27 = arith.addf %24, %26 : vector<1x128xf32>
    %c0_10 = arith.constant 0 : index
    %c0_11 = arith.constant 0 : index
    %28 = vector.load %arg7[%c0_10, %c0_11] : memref<1x128xf32, #tpu.memory_space<vmem>>, vector<1x128xf32>
    tpu.vector_store %arg7[%c0_10, %c0_11], %27 {strides = array<i32>} : memref<1x128xf32, #tpu.memory_space<vmem>>, vector<1x128xf32>,
    %c0_12 = arith.constant 0 : index
    %c0_13 = arith.constant 0 : index
    %29 = vector.load %arg8[%c0_12, %c0_13] : memref<1x128xf32, #tpu.memory_space<vmem>>, vector<1x128xf32>
    %cst_14 = arith.constant dense<0.000000e+00> : vector<128xf32>
    %30 = vector.multi_reduction <add>, %19, %cst_14 [0] : vector<16x128xf32> to vector<128xf32>
    %31 = vector.shape_cast %30 : vector<128xf32> to vector<1x128xf32>
    %32 = arith.addf %29, %31 : vector<1x128xf32>
    %c0_15 = arith.constant 0 : index
    %c0_16 = arith.constant 0 : index
    %33 = vector.load %arg8[%c0_15, %c0_16] : memref<1x128xf32, #tpu.memory_space<vmem>>, vector<1x128xf32>
    tpu.vector_store %arg8[%c0_15, %c0_16], %32 {strides = array<i32>} : memref<1x128xf32, #tpu.memory_space<vmem>>, vector<1x128xf32>,
    %c0_17 = arith.constant 0 : index
    %c0_18 = arith.constant 0 : index
    %34 = vector.load %arg9[%c0_17, %c0_18] : memref<1x128xf32, #tpu.memory_space<vmem>>, vector<1x128xf32>
    %cst_19 = arith.constant dense<0.000000e+00> : vector<128xf32>
    %35 = vector.multi_reduction <add>, %23, %cst_19 [0] : vector<16x128xf32> to vector<128xf32>
    %36 = vector.shape_cast %35 : vector<128xf32> to vector<1x128xf32>
    %37 = arith.addf %34, %36 : vector<1x128xf32>
    %c0_20 = arith.constant 0 : index
    %c0_21 = arith.constant 0 : index
    %38 = vector.load %arg9[%c0_20, %c0_21] : memref<1x128xf32, #tpu.memory_space<vmem>>, vector<1x128xf32>
    tpu.vector_store %arg9[%c0_20, %c0_21], %37 {strides = array<i32>} : memref<1x128xf32, #tpu.memory_space<vmem>>, vector<1x128xf32>,
    %c0_i32_22 = arith.constant 0 : i32
    %39 = arith.cmpi eq, %arg0, %c0_i32_22 : i32
    %40 = arith.extui %39 : i1 to i32
    %c0_i32_23 = arith.constant 0 : i32
    %41 = arith.cmpi ne, %40, %c0_i32_23 : i32
    scf.if %41 {
      %c0_24 = arith.constant 0 : index
      %c0_25 = arith.constant 0 : index
      %42 = vector.load %arg7[%c0_24, %c0_25] : memref<1x128xf32, #tpu.memory_space<vmem>>, vector<1x128xf32>
      %43 = vector.shape_cast %42 : vector<1x128xf32> to vector<1x1x128xf32>
      %cst_26 = arith.constant dense<0.000000e+00> : vector<1xf32>
      %44 = vector.multi_reduction <add>, %43, %cst_26 [1, 2] : vector<1x1x128xf32> to vector<1xf32>
      %45 = vector.shape_cast %44 : vector<1xf32> to vector<1x1x1xf32>
      %46 = vector.extract %45[0, 0, 0] : f32 from vector<1x1x1xf32>
      %c0_27 = arith.constant 0 : index
      %c0_28 = arith.constant 0 : index
      %47 = memref.load %arg4[%c0_27, %c0_28] : memref<1x1xf32, #tpu.memory_space<smem>>
      memref.store %46, %arg4[%c0_27, %c0_28] : memref<1x1xf32, #tpu.memory_space<smem>>
      %c0_29 = arith.constant 0 : index
      %c0_30 = arith.constant 0 : index
      %48 = vector.load %arg8[%c0_29, %c0_30] : memref<1x128xf32, #tpu.memory_space<vmem>>, vector<1x128xf32>
      %49 = vector.shape_cast %48 : vector<1x128xf32> to vector<1x1x128xf32>
      %cst_31 = arith.constant dense<0.000000e+00> : vector<1xf32>
      %50 = vector.multi_reduction <add>, %49, %cst_31 [1, 2] : vector<1x1x128xf32> to vector<1xf32>
      %51 = vector.shape_cast %50 : vector<1xf32> to vector<1x1x1xf32>
      %52 = vector.extract %51[0, 0, 0] : f32 from vector<1x1x1xf32>
      %c0_32 = arith.constant 0 : index
      %c0_33 = arith.constant 0 : index
      %53 = memref.load %arg5[%c0_32, %c0_33] : memref<1x1xf32, #tpu.memory_space<smem>>
      memref.store %52, %arg5[%c0_32, %c0_33] : memref<1x1xf32, #tpu.memory_space<smem>>
      %c0_34 = arith.constant 0 : index
      %c0_35 = arith.constant 0 : index
      %54 = vector.load %arg9[%c0_34, %c0_35] : memref<1x128xf32, #tpu.memory_space<vmem>>, vector<1x128xf32>
      %55 = vector.shape_cast %54 : vector<1x128xf32> to vector<1x1x128xf32>
      %cst_36 = arith.constant dense<0.000000e+00> : vector<1xf32>
      %56 = vector.multi_reduction <add>, %55, %cst_36 [1, 2] : vector<1x1x128xf32> to vector<1xf32>
      %57 = vector.shape_cast %56 : vector<1xf32> to vector<1x1x1xf32>
      %58 = vector.extract %57[0, 0, 0] : f32 from vector<1x1x1xf32>
      %c0_37 = arith.constant 0 : index
      %c0_38 = arith.constant 0 : index
      %59 = memref.load %arg6[%c0_37, %c0_38] : memref<1x1xf32, #tpu.memory_space<smem>>
      memref.store %58, %arg6[%c0_37, %c0_38] : memref<1x1xf32, #tpu.memory_space<smem>>
    } else {
    }
    return
  }
  func.func @transform_0(%arg0: i32, %arg1: memref<1xi32, #tpu.memory_space<smem>>) -> (i32, i32) {
    %c0_i32 = arith.constant 0 : i32
    %c0_i32_0 = arith.constant 0 : i32
    return %arg0, %c0_i32 : i32, i32
  }
  func.func @transform_1(%arg0: i32, %arg1: memref<1xi32, #tpu.memory_space<smem>>) -> (i32, i32) {
    %c0_i32 = arith.constant 0 : i32
    %c0_i32_0 = arith.constant 0 : i32
    return %arg0, %c0_i32 : i32, i32
  }
  func.func @transform_2(%arg0: i32, %arg1: memref<1xi32, #tpu.memory_space<smem>>) -> (i32, i32) {
    %c0_i32 = arith.constant 0 : i32
    %c0_i32_0 = arith.constant 0 : i32
    %c0_i32_1 = arith.constant 0 : i32
    return %c0_i32, %c0_i32_0 : i32, i32
  }
  func.func @transform_3(%arg0: i32, %arg1: memref<1xi32, #tpu.memory_space<smem>>) -> (i32, i32) {
    %c0_i32 = arith.constant 0 : i32
    %c0_i32_0 = arith.constant 0 : i32
    %c0_i32_1 = arith.constant 0 : i32
    return %c0_i32, %c0_i32_0 : i32, i32
  }
  func.func @transform_4(%arg0: i32, %arg1: memref<1xi32, #tpu.memory_space<smem>>) -> (i32, i32) {
    %c0_i32 = arith.constant 0 : i32
    %c0_i32_0 = arith.constant 0 : i32
    %c0_i32_1 = arith.constant 0 : i32
    return %c0_i32, %c0_i32_0 : i32, i32
  }
}

</mosaic_0001>

<bundles_post_ra>
// kernel: dice_sigmoid_eval.1
= control target key start
LH: loop header
LB: loop body
LE: loop exit
PB: predicated region body
PF: predicated region fallthrough
CT: control target
= control target key end

     0   :  { %12 = vsyncpa [#allocation8], 0  ;;  %s394_s0 = inlined_call_operand.<no memory space> [shape: s32[1], index: 0, kind: input, shape index: {}]   ;;  %s395_s1 = inlined_call_operand.hbm [shape: f32[16,128], index: 1, kind: input, shape index: {}]   ;;  %s396_s2 = inlined_call_operand.hbm [shape: f32[16,128], index: 2, kind: input, shape index: {}]   ;;  %s397_s3 = inlined_call_operand.hbm [shape: f32[1,1], index: 3, kind: output, shape index: {0}]   ;;  %s398_s4 = inlined_call_operand.hbm [shape: f32[1,1], index: 4, kind: output, shape index: {1}]   ;;  %s399_s5 = inlined_call_operand.hbm [shape: f32[1,1], index: 5, kind: output, shape index: {2}]  }
   0x1   :  { %13 = vsyncpa [#allocation11], 0 }
   0x2   :  { %14 = vsyncpa [#allocation9], 0 }
   0x3   :  { %15 = vsyncpa [#allocation14], 0  ;;  %s293_s18 = smov [#allocation7]   ;;  %s211_s22 = scalar_lea.hbm %s395_s1, 256 }
   0x4   :  { %s21_s19 = sshll.u32 %s293_s18, 4  ;;  %p212_p0 = scmp.ne.s32.totalorder %s395_s1, %s211_s22  ;;  %s22_s19 = int_to_ptr.vmem [resolvable:$true] %s21_s19 }
   0x5   :  { %p215_p1 = scmp.lt.u32.totalorder %s211_s22, %s395_s1 }
   0x7   :  { %p217_p2 = pnand %p215_p1, %p212_p0 }
   0x9   :  { %220 = shalt.err (!%p217_p2)
}
   0xa   :  { %s221_s27 = scalar_lea.vmem %s22_s19, 256  ;;  %p226_p4 = scmp.lt.s32.totalorder %s22_s19, %s22_s19 }
   0xb   :  { %p222_p3 = scmp.ne.s32.totalorder %s22_s19, %s221_s27  ;;  %p227_p5 = scmp.lt.s32.totalorder %s221_s27, %s221_s27 }
   0xd   :  { %p228_p6 = por %p227_p5, %p226_p4 }
   0xf   :  { %p229_p7 = pnand %p228_p6, %p222_p3 }
  0x11   :  { %232 = shalt.err (!%p229_p7)
}
  0x12   :  { %s294_s28 = smov 128   ;;  %s295_s29 = smov 8  }
  0x13   :  { %27 = dma.hbm_to_vmem [thread:$0]  %s395_s1, 256, %s22_s19, [#allocation8], %s294_s28, %s294_s28, %s295_s29  }
  0x14   :  { %s296_s7 = smov [#allocation10]   ;;  %s233_s11 = scalar_lea.hbm %s396_s2, 256 }
  0x15   :  { %s33_s8 = sshll.u32 %s296_s7, 4  ;;  %p234_p8 = scmp.ne.s32.totalorder %s396_s2, %s233_s11  ;;  %s34_s8 = int_to_ptr.vmem [resolvable:$true] %s33_s8 }
  0x16   :  { %p237_p9 = scmp.lt.u32.totalorder %s233_s11, %s396_s2 }
  0x18   :  { %p239_p10 = pnand %p237_p9, %p234_p8 }
  0x1a   :  { %242 = shalt.err (!%p239_p10)
}
  0x1b   :  { %s243_s16 = scalar_lea.vmem %s34_s8, 256  ;;  %p248_p12 = scmp.lt.s32.totalorder %s34_s8, %s34_s8 }
  0x1c   :  { %p244_p11 = scmp.ne.s32.totalorder %s34_s8, %s243_s16  ;;  %p249_p13 = scmp.lt.s32.totalorder %s243_s16, %s243_s16 }
  0x1e   :  { %p250_p0 = por %p249_p13, %p248_p12 }
  0x20   :  { %p251_p1 = pnand %p250_p0, %p244_p11 }
  0x22   :  { %254 = shalt.err (!%p251_p1)
}
  0x23   :  { %39 = dma.hbm_to_vmem [thread:$0]  %s396_s2, 256, %s34_s8, [#allocation11], %s294_s28, %s294_s28, %s295_s29  }
  0x24   :  { %285 = dma.done.wait [#allocation8], 256  }
  0x25   :  { %286 = vsyncadd [#allocation8], 4294967040 }
  0x26   :  { %287 = dma.done.wait [#allocation11], 256  }
  0x27   :  { %288 = vsyncadd [#allocation11], 4294967040  ;;  %v58_v0 = vlaneseq  ;;  %v297_v1 = vmov 0.0   ;;  %v65_v3 = vstv %s394_s0  ;;  %v55_v5 = vld [vmem:[#allocation10] sm:$0xff]  ;;  %v56_v6 = vld [vmem:[#allocation10 + $0x8] sm:$0xff]  ;;  %vm118_vm6 = vcmask 1040384  }
  0x28   :  { %52 = vst [vmem:[#allocation4] sm:$0x1] %v297_v1  ;;  %50 = vst [vmem:[#allocation2] sm:$0x1] %v297_v1  ;;  %v53_v7 = vld [vmem:[#allocation7] sm:$0xff]  ;;  %v54_v10 = vld [vmem:[#allocation7 + $0x8] sm:$0xff] }
  0x29   :  { %51 = vst [vmem:[#allocation3] sm:$0x1] %v297_v1  ;;  %v59_v2 = vshrl.u32 %v58_v0, 7  ;;  %vm68_vm2 = vcmp.gt.f32.partialorder %v53_v7, 0.5  ;;  %vm69_vm3 = vcmp.gt.f32.partialorder %v54_v10, 0.5  ;;  %s255_s21 = scalar_lea.hbm %s397_s3, 16 }
  0x2a   :  { %p256_p2 = scmp.ne.s32.totalorder %s397_s3, %s255_s21  ;;  %p259_p3 = scmp.lt.u32.totalorder %s255_s21, %s397_s3 }
  0x2b   :  { %v60_v4 = vadd.s32 8, %v59_v2  ;;  %vm66_vm0 = vcmp.lt.s32.totalorder %v59_v2, %v65_v3 }
  0x2c   :  { %v82_v8 = vsel %vm66_vm0, %v55_v5, 0.0  ;;  %vm74_vm4 = vmand %vm68_vm2, %vm66_vm0  ;;  %p261_p4 = pnand %p259_p3, %p256_p2 }
  0x2d   :  { %vm67_vm1 = vcmp.lt.s32.totalorder %v60_v4, %v65_v3  ;;  %v76_v12 = vsel %vm74_vm4, %v55_v5, 0.0  ;;  %v195_v13 = vsel %vm74_vm4, 1.0, %v297_v1 }
  0x2e   :  { %v83_v9 = vsel %vm67_vm1, %v56_v6, 0.0  ;;  %vm75_vm5 = vmand %vm69_vm3, %vm67_vm1 }
  0x2f   :  { %v105_v11 = vadd.f32 %v83_v9, %v82_v8  ;;  %v77_v15 = vsel %vm75_vm5, %v56_v6, 0.0  ;;  %v196_v16 = vsel %vm75_vm5, 1.0, %v297_v1  ;;  %v104_v29 = vld [vmem:[#allocation4] sm:$0x1]  ;;  %v84_v36 = vld [vmem:[#allocation2] sm:$0x1] }
  0x30   :  { %v85_v17 = vadd.f32 %v77_v15, %v76_v12  ;;  %v95_v18 = vadd.f32 %v196_v16, %v195_v13  ;;  %v94_v37 = vld [vmem:[#allocation3] sm:$0x1] }
  0x31   :  { %v106_v14 = vrot.slane %v105_v11, 4 }
  0x32   :  { %v86_v20 = vrot.slane %v85_v17, 4  ;;  %v96_v21 = vrot.slane %v95_v18, 4 }
  0x33   :  { %v107_v19 = vadd.f32 %v106_v14, %v105_v11 }
  0x34   :  { %v87_v23 = vadd.f32 %v86_v20, %v85_v17  ;;  %v97_v24 = vadd.f32 %v96_v21, %v95_v18 }
  0x35   :  { %v108_v22 = vrot.slane %v107_v19, 2 }
  0x36   :  { %v88_v26 = vrot.slane %v87_v23, 2  ;;  %v98_v27 = vrot.slane %v97_v24, 2 }
  0x37   :  { %v109_v25 = vadd.f32 %v108_v22, %v107_v19 }
  0x38   :  { %v89_v30 = vadd.f32 %v88_v26, %v87_v23  ;;  %v99_v31 = vadd.f32 %v98_v27, %v97_v24 }
  0x39   :  { %v110_v28 = vrot.slane %v109_v25, 1 }
  0x3a   :  { %v90_v33 = vrot.slane %v89_v30, 1  ;;  %v100_v34 = vrot.slane %v99_v31, 1 }
  0x3b   :  { %v111_v32 = vadd.f32 %v110_v28, %v109_v25 }
  0x3c   :  { %v91_v38 = vadd.f32 %v90_v33, %v89_v30  ;;  %v101_v39 = vadd.f32 %v100_v34, %v99_v31 }
  0x3d   :  { %v112_v35 = vadd.f32 %v111_v32, %v104_v29 }
  0x3e   :  { %v92_v40 = vadd.f32 %v91_v38, %v84_v36  ;;  %v102_v41 = vadd.f32 %v101_v39, %v94_v37 }
  0x3f   :  { %113 = vst [vmem:[#allocation4] sm:$0x1] %v112_v35 }
  0x40   :  { %93 = vst [vmem:[#allocation2] sm:$0x1] %v92_v40  ;;  %103 = vst [vmem:[#allocation3] sm:$0x1] %v102_v41 }
  0x46   :  { %v144_v42 = vld [vmem:[#allocation4] sm:$0x1] }
  0x47   :  { %v145_v43 = vsel %vm118_vm6, %v144_v42, 0.0  ;;  %v117_v44 = vld [vmem:[#allocation2] sm:$0x1]  ;;  %v131_v45 = vld [vmem:[#allocation3] sm:$0x1] }
  0x48   :  { %146 = vadd.xlane.f32.xlu1 %v145_v43  ;;  %v119_v46 = vsel %vm118_vm6, %v117_v44, 0.0  ;;  %v132_v47 = vsel %vm118_vm6, %v131_v45, 0.0 }
  0x49   :  { %120 = vadd.xlane.f32.xlu0 %v119_v46 }
  0x4d   :  { %133 = vadd.xlane.f32.xlu0 %v132_v47 }
  0xd5   :  { %v147_v48 = vpop.xlane.xlu1 %146 }
  0xd6   :  { %v148_v49 = vrot.slane %v147_v48, 4  ;;  %v121_v51 = vpop.xlane.xlu0 %120 }
  0xd7   :  { %v122_v52 = vrot.slane %v121_v51, 4 }
  0xd8   :  { %v149_v50 = vadd.f32 %v148_v49, %v147_v48 }
  0xd9   :  { %v123_v53 = vadd.f32 %v122_v52, %v121_v51 }
  0xda   :  { %v150_v54 = vrot.slane %v149_v50, 2  ;;  %v134_v55 = vpop.xlane.xlu0 %133 }
  0xdb   :  { %v124_v56 = vrot.slane %v123_v53, 2  ;;  %v135_v57 = vrot.slane %v134_v55, 4 }
  0xdc   :  { %v151_v60 = vadd.f32 %v150_v54, %v149_v50 }
  0xdd   :  { %v136_v58 = vadd.f32 %v135_v57, %v134_v55  ;;  %v125_v59 = vadd.f32 %v124_v56, %v123_v53 }
  0xde   :  { %v152_v1 = vrot.slane %v151_v60, 1 }
  0xdf   :  { %v137_v61 = vrot.slane %v136_v58, 2  ;;  %v126_v62 = vrot.slane %v125_v59, 1 }
  0xe0   :  { %v153_v4 = vadd.f32 %v152_v1, %v151_v60 }
  0xe1   :  { %v138_v63 = vadd.f32 %v137_v61, %v136_v58  ;;  %v127_v0 = vadd.f32 %v126_v62, %v125_v59 }
  0xe3   :  { %197 = vpush %v127_v0  ;;  %v139_v2 = vrot.slane %v138_v63, 1 }
  0xe5   :  { %v140_v3 = vadd.f32 %v139_v2, %v138_v63 }
  0xe7   :  { %199 = vpush %v140_v3 }
  0xe8   :  { %201 = vpush %v153_v4 }
 0x114   :  { %s198_s0 = spop %197 }
 0x115   :  { %130 = sst [smem:[#allocation12]] %s198_s0 }
 0x116   :  { %264 = shalt.err (!%p261_p4)
}
 0x117   :  { %s298_s26 = smov [#allocation12]   ;;  %s265_s8 = scalar_lea.hbm %s398_s4, 16 }
 0x118   :  { %164 = dma.smem_to_hbm %s298_s26, 16, %s397_s3, [#allocation9]  }
 0x119   :  { %s200_s29 = spop %199  ;;  %p266_p5 = scmp.ne.s32.totalorder %s398_s4, %s265_s8 }
 0x11a   :  { %143 = sst [smem:[#allocation13]] %s200_s29  ;;  %s202_s30 = spop %201 }
 0x11b   :  { %156 = sst [smem:[#allocation15]] %s202_s30  ;;  %p269_p6 = scmp.lt.u32.totalorder %s265_s8, %s398_s4 }
 0x11d   :  { %p271_p7 = pnand %p269_p6, %p266_p5 }
 0x11f   :  { %274 = shalt.err (!%p271_p7)
}
 0x120   :  { %s299_s13 = smov [#allocation13]   ;;  %s275_s1 = scalar_lea.hbm %s399_s5, 16 }
 0x121   :  { %172 = dma.smem_to_hbm %s299_s13, 16, %s398_s4, [#allocation14]  }
 0x122   :  { %p276_p8 = scmp.ne.s32.totalorder %s399_s5, %s275_s1  ;;  %p279_p9 = scmp.lt.u32.totalorder %s275_s1, %s399_s5 }
 0x124   :  { %p281_p10 = pnand %p279_p9, %p276_p8 }
 0x126   :  { %284 = shalt.err (!%p281_p10)
}
 0x127   :  { %s300_s2 = smov [#allocation15]  }
 0x128   :  { %180 = dma.smem_to_hbm %s300_s2, 16, %s399_s5, [#allocation14]  }
 0x129   :  { %289 = dma.done.wait [#allocation9], 16  }
 0x12a   :  { %290 = vsyncadd [#allocation9], 4294967280 }
 0x12b   :  { %291 = dma.done.wait [#allocation14], 32  }
 0x12c   :  { %292 = vsyncadd [#allocation14], 4294967264 }
 0x12d   :  { %190 = sfence }
 0x12e   :  { %191 = vsyncpa [#allocation8], 1 }
 0x12f   :  { %192 = vsyncpa [#allocation11], 1 }
 0x130   :  { %193 = vsyncpa [#allocation9], 1 }
 0x131   :  { %194 = vsyncpa [#allocation14], 1 }

</bundles_post_ra>
